<compile_context>
chip_gen: v6e
topology: v6e:2x2x1
jax: 0.10.0
libtpu: 0.0.40
codegen_flags: <defaults>
</compile_context>

<pallas_src>
import functools

import jax
import jax.numpy as jnp
from jax import lax
from jax.experimental import pallas as pl
from jax.experimental.pallas import tpu as pltpu


# -----------------------------------------------------------------------------
# helpers
# -----------------------------------------------------------------------------
def _pick_tile(dim, target, quantum):
    """Largest multiple of `quantum` <= target that divides dim, else dim."""
    if dim <= target:
        return dim
    t = (target // quantum) * quantum
    while t >= quantum:
        if dim % t == 0:
            return t
        t -= quantum
    return dim


def _round_up(v, m):
    return ((v + m - 1) // m) * m


def _pad_cols(w, target):
    pad = target - w.shape[-1]
    return w if pad == 0 else jnp.pad(w, ((0, 0), (0, pad)))


# -----------------------------------------------------------------------------
# Pallas kernels
# -----------------------------------------------------------------------------
def _gemm_bias_act_kernel(a_ref, b_ref, bias_ref, o_ref, acc_ref, *, act):
    @pl.when(pl.program_id(2) == 0)
    def _init():
        acc_ref[...] = jnp.zeros_like(acc_ref)

    acc_ref[...] += jnp.dot(a_ref[...], b_ref[...],
                            preferred_element_type=jnp.float32)

    @pl.when(pl.program_id(2) == pl.num_programs(2) - 1)
    def _fin():
        out = acc_ref[...] + bias_ref[...]
        if act == "relu":
            out = jnp.maximum(out, 0.0)
        o_ref[...] = out.astype(o_ref.dtype)


def gemm_bias_act(a, b, bias, act="none", tm=512, tn=512, tk=512):
    """(M,K)@(K,N) + bias(1,N) with optionally fused ReLU. a/b are bf16."""
    M, K = a.shape
    K2, Nout = b.shape
    assert K == K2
    tm = _pick_tile(M, tm, 8)
    tn = _pick_tile(Nout, tn, 128)
    tk = _pick_tile(K, tk, 128)
    grid = (M // tm, Nout // tn, K // tk)
    flops = 2 * M * K * Nout
    bytes_accessed = (a.size * a.dtype.itemsize + b.size * b.dtype.itemsize
                      + M * Nout * 4 + Nout * 4)
    return pl.pallas_call(
        functools.partial(_gemm_bias_act_kernel, act=act),
        out_shape=jax.ShapeDtypeStruct((M, Nout), jnp.float32),
        grid_spec=pltpu.PrefetchScalarGridSpec(
            num_scalar_prefetch=0,
            grid=grid,
            in_specs=[
                pl.BlockSpec((tm, tk), lambda i, j, k: (i, k)),
                pl.BlockSpec((tk, tn), lambda i, j, k: (k, j)),
                pl.BlockSpec((1, tn), lambda i, j, k: (0, j)),
            ],
            out_specs=pl.BlockSpec((tm, tn), lambda i, j, k: (i, j)),
            scratch_shapes=[pltpu.VMEM((tm, tn), jnp.float32)],
        ),
        compiler_params=pltpu.CompilerParams(
            dimension_semantics=("parallel", "parallel", "arbitrary")),
        cost_estimate=pl.CostEstimate(flops=flops, transcendentals=0,
                                      bytes_accessed=bytes_accessed),
    )(a, b, bias)


def _pool_mean_kernel(x_ref, o_ref, acc_ref, *, inv_hw):
    @pl.when(pl.program_id(1) == 0)
    def _init():
        acc_ref[...] = jnp.zeros_like(acc_ref)

    acc_ref[...] += jnp.sum(x_ref[0], axis=0, keepdims=True)

    @pl.when(pl.program_id(1) == pl.num_programs(1) - 1)
    def _fin():
        o_ref[0] = acc_ref[...] * inv_hw


def global_avg_pool(x_f, thw=512):
    """(N, HW, C) -> (N, 1, C) mean over HW  (AdaptiveAvgPool2d((1,1)))."""
    N, HW, C = x_f.shape
    thw = _pick_tile(HW, thw, 8)
    return pl.pallas_call(
        functools.partial(_pool_mean_kernel, inv_hw=1.0 / HW),
        out_shape=jax.ShapeDtypeStruct((N, 1, C), jnp.float32),
        grid_spec=pltpu.PrefetchScalarGridSpec(
            num_scalar_prefetch=0,
            grid=(N, HW // thw),
            in_specs=[pl.BlockSpec((1, thw, C), lambda n, h: (n, h, 0))],
            out_specs=pl.BlockSpec((1, 1, C), lambda n, h: (n, 0, 0)),
            scratch_shapes=[pltpu.VMEM((1, C), jnp.float32)],
        ),
        compiler_params=pltpu.CompilerParams(
            dimension_semantics=("parallel", "arbitrary")),
    )(x_f)


def _chan_mlp_kernel(pooled_ref, w1_ref, b1_ref, w2_ref, b2_ref, o_ref):
    p = pooled_ref[...][:, 0, :]                                     # (N, C)
    h = jnp.dot(p, w1_ref[...], preferred_element_type=jnp.float32) + b1_ref[...]
    h = jnp.where(h > 0, h, 0.01 * h)                                # LeakyReLU(0.01)
    a = jnp.dot(h, w2_ref[...], preferred_element_type=jnp.float32) + b2_ref[...]
    o_ref[...] = jax.nn.sigmoid(a)[:, None, :]


def channel_attention(pooled, w1, b1, w2, b2):
    """pooled: (N,1,C) -> sigmoid(MLP) attention map (N,1,C). Tiny; runs once."""
    N, _, C = pooled.shape
    Cr = w1.shape[1]
    return pl.pallas_call(
        _chan_mlp_kernel,
        out_shape=jax.ShapeDtypeStruct((N, 1, C), jnp.float32),
        grid_spec=pltpu.PrefetchScalarGridSpec(
            num_scalar_prefetch=0,
            grid=(1,),
            in_specs=[
                pl.BlockSpec((N, 1, C), lambda i: (0, 0, 0)),
                pl.BlockSpec((C, Cr), lambda i: (0, 0)),
                pl.BlockSpec((1, Cr), lambda i: (0, 0)),
                pl.BlockSpec((Cr, C), lambda i: (0, 0)),
                pl.BlockSpec((1, C), lambda i: (0, 0)),
            ],
            out_specs=pl.BlockSpec((N, 1, C), lambda i: (0, 0, 0)),
        ),
    )(pooled, w1, b1, w2, b2)


def _fuse_kernel(x_ref, proc_ref, chan_ref, spat_ref, o_ref):
    # comb_map = chan (1,C) + spat (tq,1) -> (tq,C);  out = x + proc * comb
    comb = chan_ref[0] + spat_ref[0]
    o_ref[0] = x_ref[0] + proc_ref[0] * comb


def fuse_attention(x_f, proc_f, chan, spat_f, tq=512):
    N, HW, C = x_f.shape
    tq = _pick_tile(HW, tq, 8)
    return pl.pallas_call(
        _fuse_kernel,
        out_shape=jax.ShapeDtypeStruct((N, HW, C), jnp.float32),
        grid_spec=pltpu.PrefetchScalarGridSpec(
            num_scalar_prefetch=0,
            grid=(N, HW // tq),
            in_specs=[
                pl.BlockSpec((1, tq, C), lambda n, q: (n, q, 0)),
                pl.BlockSpec((1, tq, C), lambda n, q: (n, q, 0)),
                pl.BlockSpec((1, 1, C), lambda n, q: (n, 0, 0)),
                pl.BlockSpec((1, tq, 1), lambda n, q: (n, q, 0)),
            ],
            out_specs=pl.BlockSpec((1, tq, C), lambda n, q: (n, q, 0)),
        ),
        compiler_params=pltpu.CompilerParams(
            dimension_semantics=("parallel", "parallel")),
    )(x_f, proc_f, chan, spat_f)


def _mlp_kernel(x_ref, w1_ref, b1_ref, w2_ref, b2_ref, o_ref):
    h = jnp.dot(x_ref[...], w1_ref[...],
                preferred_element_type=jnp.float32) + b1_ref[...]
    h = jnp.maximum(h, 0.0)
    o_ref[...] = jnp.dot(h.astype(jnp.bfloat16), w2_ref[...],
                         preferred_element_type=jnp.float32) + b2_ref[...]


def fused_mlp(x, w1, b1, w2, b2, tm=512):
    """ReLU MLP: (M,Din)@(Din,Hp) -> relu -> @(Hp,Hp). x/w1/w2 bf16, bias f32."""
    M, Din = x.shape
    Hp = w1.shape[1]
    tm = _pick_tile(M, tm, 8)
    return pl.pallas_call(
        _mlp_kernel,
        out_shape=jax.ShapeDtypeStruct((M, Hp), jnp.float32),
        grid_spec=pltpu.PrefetchScalarGridSpec(
            num_scalar_prefetch=0,
            grid=(M // tm,),
            in_specs=[
                pl.BlockSpec((tm, Din), lambda i: (i, 0)),
                pl.BlockSpec((Din, Hp), lambda i: (0, 0)),
                pl.BlockSpec((1, Hp), lambda i: (0, 0)),
                pl.BlockSpec((Hp, Hp), lambda i: (0, 0)),
                pl.BlockSpec((1, Hp), lambda i: (0, 0)),
            ],
            out_specs=pl.BlockSpec((tm, Hp), lambda i: (i, 0)),
        ),
        compiler_params=pltpu.CompilerParams(dimension_semantics=("parallel",)),
        cost_estimate=pl.CostEstimate(
            flops=2 * M * (Din + Hp) * Hp, transcendentals=0,
            bytes_accessed=x.size * 2 + (Din * Hp + Hp * Hp) * 2 + M * Hp * 4),
    )(x, w1, b1, w2, b2)


# -----------------------------------------------------------------------------
# Glue (reshapes / im2col / parameter prep) in plain JAX
# -----------------------------------------------------------------------------
def _im2col_3x3(x_nhwc):
    """3x3, stride 1, pad 1 patches: (N,H,W,C) -> (N*H*W, 9*C)."""
    N, H, W, C = x_nhwc.shape
    xp = jnp.pad(x_nhwc, ((0, 0), (1, 1), (1, 1), (0, 0)))
    cols = [xp[:, dy:dy + H, dx:dx + W, :] for dy in range(3) for dx in range(3)]
    return jnp.concatenate(cols, axis=-1).reshape(N * H * W, 9 * C)


def aemf_forward(params, vis_nchw, other_nchw):
    N, C, H, W = vis_nchw.shape
    HW = H * W
    bf16 = jnp.bfloat16
    x = jnp.transpose(vis_nchw, (0, 2, 3, 1)).astype(jnp.float32)        # NHWC

    conv1_w = params["conv1_w"].reshape(9 * C, C).astype(bf16)
    conv2_w = params["conv2_w"].reshape(9 * C, C).astype(bf16)
    # no bias; pad output to 128 lanes for dense stores, slice col 0 after
    spat_w = _pad_cols(params["spat_w"].reshape(9 * C, 1), 128).astype(bf16)

    # ---------------- AFRM ----------------
    cols1 = _im2col_3x3(x).astype(bf16)
    h = gemm_bias_act(cols1, conv1_w, params["conv1_b"][None, :], act="relu")

    cols2 = _im2col_3x3(h.reshape(N, H, W, C)).astype(bf16)
    proc = gemm_bias_act(cols2, conv2_w, params["conv2_b"][None, :], act="none")

    # spatial attention runs on proc (output of conv_start_2), bias-free
    cols3 = _im2col_3x3(proc.reshape(N, H, W, C)).astype(bf16)
    spat_pad = gemm_bias_act(cols3, spat_w, jnp.zeros((1, 128), jnp.float32),
                             act="none")
    spat_f = spat_pad[:, :1].reshape(N, HW, 1)

    proc_f = proc.reshape(N, HW, C)
    pooled = global_avg_pool(proc_f)                                     # (N,1,C)
    chan = channel_attention(pooled, params["ca_w1"], params["ca_b1"][None, :],
                             params["ca_w2"], params["ca_b2"][None, :])  # (N,1,C)

    x_f = x.reshape(N, HW, C)
    final_f = fuse_attention(x_f, proc_f, chan, spat_f)                  # (N,HW,C)
    improved = jnp.transpose(final_f.reshape(N, H, W, C), (0, 3, 1, 2))  # NCHW

    # ---------------- AEMF head ----------------
    # torch.cat(..., dim=-1) on NCHW tensors concatenates along the W axis.
    merged = jnp.concatenate([improved, other_nchw.astype(jnp.float32)], axis=-1)
    Din = merged.shape[-1]
    Hd = params["fc1_w"].shape[1]
    Hp = max(_round_up(Hd, 128), 128)                   # lane-dense hidden/out
    fc1_w = _pad_cols(params["fc1_w"], Hp).astype(bf16)
    fc1_b = _pad_cols(params["fc1_b"][None, :], Hp)
    fc2_w = jnp.pad(params["fc2_w"], ((0, Hp - Hd), (0, Hp - Hd))).astype(bf16)
    fc2_b = _pad_cols(params["fc2_b"][None, :], Hp)

    out_pad = fused_mlp(merged.reshape(N * C * H, Din).astype(bf16),
                        fc1_w, fc1_b, fc2_w, fc2_b)
    return out_pad[:, :Hd].reshape(N, C, H, Hd)


def aemf_reference(params, vis_nchw, other_nchw):
    """Pure-JAX (XLA, f32) reference of the PyTorch forward, for validation."""
    x = jnp.transpose(vis_nchw, (0, 2, 3, 1)).astype(jnp.float32)

    def conv3x3(inp, w, b=None):
        out = lax.conv_general_dilated(inp, w, (1, 1), "SAME",
                                       dimension_numbers=("NHWC", "HWIO", "NHWC"))
        return out if b is None else out + b

    h = jax.nn.relu(conv3x3(x, params["conv1_w"], params["conv1_b"]))
    proc = conv3x3(h, params["conv2_w"], params["conv2_b"])
    pooled = proc.mean(axis=(1, 2))                                      # (N, C)
    z = pooled @ params["ca_w1"] + params["ca_b1"]
    z = jnp.where(z > 0, z, 0.01 * z)
    chan = jax.nn.sigmoid(z @ params["ca_w2"] + params["ca_b2"])         # (N, C)
    spat = conv3x3(proc, params["spat_w"])                               # (N,H,W,1)
    comb = chan[:, None, None, :] + spat
    final = x + proc * comb
    improved = jnp.transpose(final, (0, 3, 1, 2))
    merged = jnp.concatenate([improved, other_nchw.astype(jnp.float32)], axis=-1)
    hlin = jax.nn.relu(merged @ params["fc1_w"] + params["fc1_b"])
    return hlin @ params["fc2_w"] + params["fc2_b"]


def init_params(key, channels, red, visual_dim, other_dim, hidden_dim):
    ks = jax.random.split(key, 13)
    C, Cr = channels, channels // red

    def w(k, shape, fan_in):
        return jax.random.normal(k, shape, jnp.float32) / jnp.sqrt(float(fan_in))

    return {
        "conv1_w": w(ks[0], (3, 3, C, C), 9 * C),        # HWIO
        "conv1_b": w(ks[1], (C,), C),
        "conv2_w": w(ks[2], (3, 3, C, C), 9 * C),
        "conv2_b": w(ks[3], (C,), C),
        "ca_w1": w(ks[4], (C, Cr), C),                   # 1x1 conv == linear on C
        "ca_b1": w(ks[5], (Cr,), C),
        "ca_w2": w(ks[6], (Cr, C), Cr),
        "ca_b2": w(ks[7], (C,), Cr),
        "spat_w": w(ks[8], (3, 3, C, 1), 9 * C),         # no bias
        "fc1_w": w(ks[9], (visual_dim + other_dim, hidden_dim), visual_dim + other_dim),
        "fc1_b": w(ks[10], (hidden_dim,), hidden_dim),
        "fc2_w": w(ks[11], (hidden_dim, hidden_dim), hidden_dim),
        "fc2_b": w(ks[12], (hidden_dim,), hidden_dim),
    }


if __name__ == "__main__":
    # Small demo shapes (original AFRM hardcodes 2048 channels; see NOTE above).
    N, C, H, W = 2, 128, 8, 8
    Wo = 8                                   # spatial width of other_feats
    visual_dim, other_dim, hidden_dim, red = W, Wo, 32, 4

    key = jax.random.PRNGKey(0)
    kp, kv, ko = jax.random.split(key, 3)
    params = init_params(kp, C, red, visual_dim, other_dim, hidden_dim)
    vis = jax.random.normal(kv, (N, C, H, W), jnp.float32)
    other = jax.random.normal(ko, (N, C, H, Wo), jnp.float32)

    out = jax.block_until_ready(aemf_forward(params, vis, other))
    ref = jax.block_until_ready(aemf_reference(params, vis, other))

    assert out.shape == (N, C, H, hidden_dim), out.shape
    rel_err = float(jnp.max(jnp.abs(out - ref)) / (jnp.max(jnp.abs(ref)) + 1e-6))
    assert rel_err < 5e-2, f"mismatch vs reference: rel-max-err={rel_err}"
    print("KERNEL_OK")
</pallas_src>

<mosaic_0001>
module attributes {stable_mosaic.version = 11 : i64} {
  func.func @_gemm_bias_act_kernel(%arg0: i32, %arg1: i32, %arg2: i32, %arg3: memref<128x384xbf16, #tpu.memory_space<vmem>>, %arg4: memref<384x128xbf16, #tpu.memory_space<vmem>>, %arg5: memref<1x128xf32, #tpu.memory_space<vmem>>, %arg6: memref<128x128xf32, #tpu.memory_space<vmem>>, %arg7: memref<128x128xf32, #tpu.memory_space<vmem>>) attributes {dimension_semantics = [#tpu.dimension_semantics<parallel>, #tpu.dimension_semantics<parallel>, #tpu.dimension_semantics<arbitrary>], iteration_bounds = array<i64: 1, 1, 3>, scalar_prefetch = 0 : i64, scratch_operands = 1 : i64, tpu.core_type = #tpu.core_type<tc>, window_params = [{transform_indices = @transform_0, window_bounds = array<i64: 128, 384>}, {transform_indices = @transform_1, window_bounds = array<i64: 384, 128>}, {transform_indices = @transform_2, window_bounds = array<i64: 1, 128>}, {transform_indices = @transform_3, window_bounds = array<i64: 128, 128>}]} {
    %c0_i32 = arith.constant 0 : i32
    %0 = arith.cmpi eq, %arg2, %c0_i32 : i32
    %1 = arith.extui %0 : i1 to i32
    %c0_i32_0 = arith.constant 0 : i32
    %2 = arith.cmpi ne, %1, %c0_i32_0 : i32
    scf.if %2 {
      %cst_9 = arith.constant 0.000000e+00 : f32
      %12 = vector.broadcast %cst_9 : f32 to vector<128x128xf32>
      %c0_10 = arith.constant 0 : index
      %c0_11 = arith.constant 0 : index
      %13 = vector.load %arg7[%c0_10, %c0_11] : memref<128x128xf32, #tpu.memory_space<vmem>>, vector<128x128xf32>
      tpu.vector_store %arg7[%c0_10, %c0_11], %12 {strides = array<i32>} : memref<128x128xf32, #tpu.memory_space<vmem>>, vector<128x128xf32>,
    } else {
    }
    %c0 = arith.constant 0 : index
    %c0_1 = arith.constant 0 : index
    %3 = vector.load %arg7[%c0, %c0_1] : memref<128x128xf32, #tpu.memory_space<vmem>>, vector<128x128xf32>
    %c0_2 = arith.constant 0 : index
    %c0_3 = arith.constant 0 : index
    %4 = vector.load %arg3[%c0_2, %c0_3] : memref<128x384xbf16, #tpu.memory_space<vmem>>, vector<128x384xbf16>
    %c0_4 = arith.constant 0 : index
    %c0_5 = arith.constant 0 : index
    %5 = vector.load %arg4[%c0_4, %c0_5] : memref<384x128xbf16, #tpu.memory_space<vmem>>, vector<384x128xbf16>
    %cst = arith.constant dense<0.000000e+00> : vector<128x128xf32>
    %6 = tpu.matmul %4, %5, %cst {dimension_numbers = #tpu.dot_dimension_numbers<[1], [0], [0], [1], [0, 0, 1, 1], [], []>} : vector<128x384xbf16>, vector<384x128xbf16>, vector<128x128xf32> -> vector<128x128xf32>
    %7 = arith.addf %3, %6 : vector<128x128xf32>
    %c0_6 = arith.constant 0 : index
    %c0_7 = arith.constant 0 : index
    %8 = vector.load %arg7[%c0_6, %c0_7] : memref<128x128xf32, #tpu.memory_space<vmem>>, vector<128x128xf32>
    tpu.vector_store %arg7[%c0_6, %c0_7], %7 {strides = array<i32>} : memref<128x128xf32, #tpu.memory_space<vmem>>, vector<128x128xf32>,
    %c2_i32 = arith.constant 2 : i32
    %9 = arith.cmpi eq, %arg2, %c2_i32 : i32
    %10 = arith.extui %9 : i1 to i32
    %c0_i32_8 = arith.constant 0 : i32
    %11 = arith.cmpi ne, %10, %c0_i32_8 : i32
    scf.if %11 {
      %c0_9 = arith.constant 0 : index
      %c0_10 = arith.constant 0 : index
      %12 = vector.load %arg7[%c0_9, %c0_10] : memref<128x128xf32, #tpu.memory_space<vmem>>, vector<128x128xf32>
      %c0_11 = arith.constant 0 : index
      %c0_12 = arith.constant 0 : index
      %13 = vector.load %arg5[%c0_11, %c0_12] : memref<1x128xf32, #tpu.memory_space<vmem>>, vector<1x128xf32>
      %14 = vector.broadcast %13 : vector<1x128xf32> to vector<128x128xf32>
      %15 = arith.addf %12, %14 : vector<128x128xf32>
      %cst_13 = arith.constant 0.000000e+00 : f32
      %16 = vector.broadcast %cst_13 : f32 to vector<128x128xf32>
      %17 = arith.maximumf %15, %16 : vector<128x128xf32>
      %c0_14 = arith.constant 0 : index
      %c0_15 = arith.constant 0 : index
      %18 = vector.load %arg6[%c0_14, %c0_15] : memref<128x128xf32, #tpu.memory_space<vmem>>, vector<128x128xf32>
      tpu.vector_store %arg6[%c0_14, %c0_15], %17 {strides = array<i32>} : memref<128x128xf32, #tpu.memory_space<vmem>>, vector<128x128xf32>,
    } else {
    }
    return
  }
  func.func @transform_0(%arg0: i32, %arg1: i32, %arg2: i32) -> (i32, i32) {
    %c0_i32 = arith.constant 0 : i32
    return %arg0, %arg2 : i32, i32
  }
  func.func @transform_1(%arg0: i32, %arg1: i32, %arg2: i32) -> (i32, i32) {
    %c0_i32 = arith.constant 0 : i32
    return %arg2, %arg1 : i32, i32
  }
  func.func @transform_2(%arg0: i32, %arg1: i32, %arg2: i32) -> (i32, i32) {
    %c0_i32 = arith.constant 0 : i32
    %c0_i32_0 = arith.constant 0 : i32
    return %c0_i32, %arg1 : i32, i32
  }
  func.func @transform_3(%arg0: i32, %arg1: i32, %arg2: i32) -> (i32, i32) {
    %c0_i32 = arith.constant 0 : i32
    return %arg0, %arg1 : i32, i32
  }
}

</mosaic_0001>

<bundles_post_ra>
// kernel: tpu_custom_call.1
= control target key start
LH: loop header
LB: loop body
LE: loop exit
PB: predicated region body
PF: predicated region fallthrough
CT: control target
= control target key end

     0   :  { %8 = vsyncpa [#allocation4], 0  ;;  %s1753_s0 = inlined_call_operand.hbm [shape: bf16[128,1152], index: 0, kind: input, shape index: {}]   ;;  %s1754_s1 = inlined_call_operand.hbm [shape: bf16[1152,128], index: 1, kind: input, shape index: {}]   ;;  %s1755_s2 = inlined_call_operand.vmem [shape: f32[1,128], index: 2, kind: input, shape index: {}]   ;;  %s1756_s3 = inlined_call_operand.hbm [shape: f32[128,128], index: 3, kind: output, shape index: {}]  }
   0x1   :  { %10 = vsyncpa [#allocation4 + $0x1], 0 }
   0x2   :  { %11 = vsyncpa [#allocation7], 0 }
   0x3   :  { %13 = vsyncpa [#allocation7 + $0x1], 0 }
   0x4   :  { %14 = vsyncpa [#allocation5], 0  ;;  %s1559_s12 = smov 0   ;;  %s1561_s13 = smov 0  }
   0x5   :  { %s1563_s14 = smov 0   ;;  %s1565_s15 = smov 0  }
   0x6   :  { %s1567_s16 = smov 0   ;;  %s1569_s17 = smov 0  }
   0x7 LB: > { %s1078_s18 = sadd.s32 4294967295, %s1526_s17   ;;  %s32_s19 = sadd.s32 1, %s1522_s16  ;;  %s1526_s17 = sphi %s1569_s17, %s20_s17   ;;  %s1522_s16 = sphi %s1567_s16, %s1765_s16   ;;  %s1518_s15 = sphi %s1565_s15, %s1764_s15   ;;  %s1514_s14 = sphi %s1563_s14, %s1763_s14   ;;  %s1510_s13 = sphi %s1561_s13, %s1762_s13   ;;  %s1506_s12 = sphi %s1559_s12, %s1761_s12  }
   0x8   : > { %p33_p0 = scmp.ge.s32.totalorder %s32_s19, 3  ;;  %s48_s20 = sadd.s32 1, %s1514_s14 }
   0x9   : > { %p55_p1 = scmp.ne.s32.totalorder %s1514_s14, %s1510_s13  ;;  %p56_p2 = scmp.eq.s32.totalorder %s1526_s17, 0 }
   0xa   : > { %s1767_s19 = smov (%p33_p0, %s32_s19), 0  ;;  %p61_p4 = scmp.ne.s32.totalorder %s1510_s13, %s1506_s12 }
   0xb   : > { %p57_p3 = por %p56_p2, %p55_p1  ;;  %s44_s21 = ssub.s32 %s1522_s16, %s1767_s19 }
   0xc   : > { %p62_p5 = scmp.eq.s32.totalorder %s1078_s18, 0  ;;  %p46_p6 = scmp.eq.s32.totalorder %s44_s21, 0 }
   0xd   : > { %p1272_p8 = scmp.lt.s32.totalorder %s1526_s17, 3  ;;  %s1609_s24 = sand.u32 1, %s1514_s14  }
   0xe   : > { %p1600_p7 = por %p62_p5, %p61_p4  ;;  %s1140_s25 = smul.u32 192, %s1522_s16 }
   0xf   : > { %s1606_s23 = scalar_select %p46_p6, %s1514_s14, %s48_s20  }
  0x10   : > { %s1254_s26 = smul.u32 192, %s1609_s24  ;;  %s186_s29 = scalar_lea.hbm %s1753_s0, %s1140_s25 }
  0x11   : > { %p1616_p9 = pnand %p1272_p8, %p57_p3  ;;  %p1084_p10 = scmp.ge.s32.totalorder %s1526_s17, 1 }
  0x12   : > { %s177_s4 = scalar_lea.vmem [#allocation3], %s1254_s26  ;;  %s174_s6 = scalar_lea.sflag [#allocation4], %s1609_s24 }
  0x13   : > { %s187_s5 = sshll.u32 %s177_s4, 4  ;;  %p1390_p11 = pneg %p1616_p9  ;;  %s188_s5 = int_to_ptr.vmem [resolvable:$true] %s187_s5 }
  0x14   : > { %s1401_s7 = scalar_lea.vmem %s188_s5, 3072  ;;  %s1528_s8 = smov [#allocation3]  }
  0x15   : > { %p1402_p12 = scmp.ne.s32.totalorder %s188_s5, %s1401_s7  ;;  %s1406_s9 = sshll.u32 %s1528_s8, 4  ;;  %s1407_s9 = int_to_ptr.vmem [resolvable:$false] %s1406_s9 }
  0x16   : > { %s1408_s10 = scalar_lea.vmem %s1407_s9, 6144  ;;  %p1409_p1 = scmp.lt.s32.totalorder %s188_s5, %s1407_s9 }
  0x17   : > { %p1404_p13 = pnand %p1402_p12, %p1390_p11  ;;  %p1410_p2 = scmp.lt.s32.totalorder %s1408_s10, %s1401_s7 }
  0x19   : > { %p1405_p0 = pneg %p1404_p13  ;;  %p1411_p3 = por %p1410_p2, %p1409_p1 }
  0x1b   : > { %p1412_p4 = pnand %p1411_p3, %p1405_p0 }
  0x1d   : > { %1415 = shalt.err (!%p1412_p4)
}
  0x1e   : > { %s1529_s11 = smov 576   ;;  %s1530_s12 = smov 192  }
  0x1f   : > { %s1531_s20 = smov 12   ;;  %p217_p5 = scmp.lt.s32.totalorder %s1526_s17, 4 }
  0x20   : > { %1268 = dma.hbm_to_vmem [thread:$0]  (!%p1616_p9), %s186_s29, 3072, %s188_s5, %s174_s6, %s1529_s11, %s1530_s12, %s1531_s20  }
  0x21   : > { %s1141_s21 = smul.u32 3072, %s1522_s16  ;;  %p1635_p6 = pnand %p1084_p10, %p217_p5 }
  0x22   : > { %s201_s27 = scalar_lea.vmem [#allocation6], %s1254_s26  ;;  %s198_s9 = scalar_lea.sflag [#allocation7], %s1609_s24 }
  0x23   : > { %s209_s28 = sshll.u32 %s201_s27, 4  ;;  %s208_s8 = scalar_lea.hbm %s1754_s1, %s1141_s21  ;;  %s210_s28 = int_to_ptr.vmem [resolvable:$true] %s209_s28 }
  0x24   : > { %s1429_s10 = scalar_lea.vmem %s210_s28, 3072  ;;  %s1532_s29 = smov [#allocation6]  }
  0x25   : > { %p1430_p8 = scmp.ne.s32.totalorder %s210_s28, %s1429_s10  ;;  %s1434_s5 = sshll.u32 %s1532_s29, 4  ;;  %s1435_s5 = int_to_ptr.vmem [resolvable:$false] %s1434_s5 }
  0x26   : > { %s1436_s6 = scalar_lea.vmem %s1435_s5, 6144  ;;  %p1437_p10 = scmp.lt.s32.totalorder %s210_s28, %s1435_s5 }
  0x27   : > { %p1432_p12 = pnand %p1430_p8, %p1390_p11  ;;  %p1438_p0 = scmp.lt.s32.totalorder %s1436_s6, %s1429_s10 }
  0x29   : > { %p1433_p13 = pneg %p1432_p12  ;;  %p1439_p1 = por %p1438_p0, %p1437_p10 }
  0x2b   : > { %p1440_p2 = pnand %p1439_p1, %p1433_p13 }
  0x2d   : > { %1443 = shalt.err (!%p1440_p2)
}
  0x2e   : > { %s1533_s26 = smov 64   ;;  %s1534_s11 = smov 4  }
  0x2f   : > { %1271 = dma.hbm_to_vmem [thread:$0]  (!%p1616_p9), %s208_s8, 3072, %s210_s28, %s198_s9, %s1533_s26, %s1533_s26, %s1534_s11  }
  0x30   : > { %221 = sbr.rel (%p1635_p6) target bundleno = 396 (0x18c), region = 32  ;;  %s223_s24 = sand.u32 (!%p1635_p6), 1, %s1510_s13  }
  0x31   : > { %s1256_s12 = smul.u32 (!%p1635_p6), 192, %s223_s24  ;;  %s224_s20 = scalar_lea.sflag (!%p1635_p6), [#allocation4], %s223_s24 }
  0x33   : > { %s1653_s21 = scalar_lea.vmem (!%p1635_p6), [#allocation3], %s1256_s12 }
  0x35   : > { %1493 = dma.done.wait (%p1600_p7), %s224_s20, 3072  }
  0x36   : > { %1495 = vsyncadd (%p1600_p7), %s224_s20, 4294964224  ;;  %s233_s27 = scalar_lea.sflag [#allocation7], %s223_s24  ;;  %s1659_s4 = scalar_lea.vmem [#allocation6], %s1256_s12 }
  0x37   : > { %1497 = dma.done.wait (%p1600_p7), %s233_s27, 3072  }
  0x38   : > { %1499 = vsyncadd (%p1600_p7), %s233_s27, 4294964224  ;;  %p1085_p9 = scmp.ne.s32.totalorder %s1518_s15, 0 }
  0x3a   : > { %273 = sbr.rel (%p1085_p9) target bundleno = 72 (0x48), region = 44 }
  0x3f   : > { %v1535_v0 = vmov 0.0  }
  0x40   : > { %274 = vst [vmem:[#allocation2 + $0x30] sm:$0xff] %v1535_v0  ;;  %275 = vst [vmem:[#allocation2] sm:$0xff] %v1535_v0 }
  0x41   : > { %276 = vst [vmem:[#allocation2 + $0x58] sm:$0xff] %v1535_v0  ;;  %277 = vst [vmem:[#allocation2 + $0x18] sm:$0xff] %v1535_v0 }
  0x42   : > { %278 = vst [vmem:[#allocation2 + $0x50] sm:$0xff] %v1535_v0  ;;  %279 = vst [vmem:[#allocation2 + $0x68] sm:$0xff] %v1535_v0 }
  0x43   : > { %280 = vst [vmem:[#allocation2 + $0x8] sm:$0xff] %v1535_v0  ;;  %281 = vst [vmem:[#allocation2 + $0x48] sm:$0xff] %v1535_v0 }
  0x44   : > { %282 = vst [vmem:[#allocation2 + $0x40] sm:$0xff] %v1535_v0  ;;  %283 = vst [vmem:[#allocation2 + $0x20] sm:$0xff] %v1535_v0 }
  0x45   : > { %284 = vst [vmem:[#allocation2 + $0x10] sm:$0xff] %v1535_v0  ;;  %285 = vst [vmem:[#allocation2 + $0x38] sm:$0xff] %v1535_v0 }
  0x46   : > { %286 = vst [vmem:[#allocation2 + $0x60] sm:$0xff] %v1535_v0  ;;  %287 = vst [vmem:[#allocation2 + $0x70] sm:$0xff] %v1535_v0 }
  0x47   : > { %288 = vst [vmem:[#allocation2 + $0x78] sm:$0xff] %v1535_v0  ;;  %289 = vst [vmem:[#allocation2 + $0x28] sm:$0xff] %v1535_v0 }
  0x48 PF: > { %v1332_v1 = vld [vmem:[%s1659_s4 + $0x78] sm:$0xff]   ;;  %v1335_v4 = vld [vmem:[%s1659_s4 + $0x70] sm:$0xff]   ;;  %v1338_v7 = vld [vmem:[%s1659_s4 + $0x68] sm:$0xff]   ;;  %p1134_p7 = scmp.ne.s32.totalorder %s1518_s15, 2 }
  0x49   : > { %v1333_v2 = vld [vmem:[%s1659_s4 + $0x38] sm:$0xff]   ;;  %1142 = vmatprep.subr.bf16.mxu0 %v1332_v1  ;;  %v1336_v5 = vld [vmem:[%s1659_s4 + $0x30] sm:$0xff]   ;;  %v1339_v8 = vld [vmem:[%s1659_s4 + $0x28] sm:$0xff]  }
  0x4a   : > { %v1334_v3 = vld [vmem:[%s1659_s4 + $0xb8] sm:$0xff]   ;;  %1143 = vmatpush3.bf16.msra.mxu0 %v1333_v2  ;;  %v1337_v6 = vld [vmem:[%s1659_s4 + $0xb0] sm:$0xff]   ;;  %v1340_v9 = vld [vmem:[%s1659_s4 + $0xa8] sm:$0xff]  }
  0x4b   : > { %1222 = vmatprep.subr.bf16.mxu1 %v1334_v3  ;;  %1144 = vmatprep.subr.bf16.mxu0 %v1335_v4  ;;  %v1341_v10 = vld [vmem:[%s1659_s4 + $0x60] sm:$0xff]   ;;  %v1344_v13 = vld [vmem:[%s1659_s4 + $0x58] sm:$0xff]   ;;  %v1347_v16 = vld [vmem:[%s1659_s4 + $0x50] sm:$0xff]  }
  0x4c   : > { %1223 = vmatpush3.bf16.msra.mxu1 %v1334_v3  ;;  %v1342_v11 = vld [vmem:[%s1659_s4 + $0x20] sm:$0xff]   ;;  %v1346_v14 = vld [vmem:[%s1659_s4 + $0x98] sm:$0xff]   ;;  %v1349_v17 = vld [vmem:[%s1659_s4 + $0x90] sm:$0xff]  }
  0x4d   : > { %1224 = vmatprep.subr.bf16.mxu1 %v1337_v6  ;;  %v1343_v12 = vld [vmem:[%s1659_s4 + $0xa0] sm:$0xff]   ;;  %v1345_v15 = vld [vmem:[%s1659_s4 + $0x18] sm:$0xff]   ;;  %v1348_v18 = vld [vmem:[%s1659_s4 + $0x10] sm:$0xff]  }
  0x4e   : > { %1145 = vmatpush3.bf16.msra.mxu0 %v1336_v5  ;;  %v1350_v19 = vld [vmem:[%s1659_s4 + $0x48] sm:$0xff]   ;;  %v1353_v22 = vld [vmem:[%s1659_s4 + $0x40] sm:$0xff]   ;;  %v1368_v33 = vld [vmem:[%s1653_s21 + $0x50] ss:$12 sps:$4 sm:$0xff]  }
  0x4f   : > { %1146 = vmatprep.subr.bf16.mxu0 %v1338_v7  ;;  %v1351_v20 = vld [vmem:[%s1659_s4 + $0x8] sm:$0xff]   ;;  %v1355_v23 = vld [vmem:[%s1659_s4 + $0x80] sm:$0xff]   ;;  %v1366_v35 = vld [vmem:[%s1653_s21 + $0x30] ss:$12 sps:$4 sm:$0xff]  }
  0x50   : > { %1225 = vmatpush3.bf16.msra.mxu1 %v1337_v6  ;;  %v1352_v21 = vld [vmem:[%s1659_s4 + $0x88] sm:$0xff]   ;;  %v1358_v24 = vld [vmem:[%s1653_s21 + $0x4] ss:$12 sps:$4 sm:$0xff]   ;;  %v1364_v32 = vld [vmem:[%s1653_s21 + $0x34] ss:$12 sps:$4 sm:$0xff]  }
  0x51   : > { %1226 = vmatprep.subr.bf16.mxu1 %v1340_v9  ;;  %v1359_v25 = vld [vmem:[%s1653_s21 + $0x8] ss:$12 sps:$4 sm:$0xff]   ;;  %v1354_v26 = vld [vmem:[%s1659_s4] sm:$0xff]   ;;  %690 = vmatprep.mubr.bf16.mxu0 %v1358_v24  ;;  %v1369_v36 = vld [vmem:[%s1653_s21 + $0x4c] ss:$12 sps:$4 sm:$0xff]  }
  0x52   : > { %1147 = vmatpush3.bf16.msra.mxu0 %v1339_v8  ;;  %1238 = vmatprep.mubr.bf16.mxu1 %v1359_v25  ;;  %v1356_v27 = vld [vmem:[%s1653_s21] ss:$12 sps:$4 sm:$0xff]   ;;  %v1361_v28 = vld [vmem:[%s1653_s21 + $0x1c] ss:$12 sps:$4 sm:$0xff]   ;;  %v1367_v30 = vld [vmem:[%s1653_s21 + $0x38] ss:$12 sps:$4 sm:$0xff]  }
  0x53   : > { %1148 = vmatprep.subr.bf16.mxu0 %v1341_v10  ;;  %v1360_v29 = vld [vmem:[%s1653_s21 + $0x20] ss:$12 sps:$4 sm:$0xff]   ;;  %v1363_v31 = vld [vmem:[%s1653_s21 + $0x18] ss:$12 sps:$4 sm:$0xff]   ;;  %v1375_v34 = vld [vmem:[%s1653_s21 + $0x68] ss:$12 sps:$4 sm:$0xff]  }
  0x54   : > { %1227 = vmatpush3.bf16.msra.mxu1 %v1340_v9  ;;  %v1376_v37 = vld [vmem:[%s1653_s21 + $0x80] ss:$12 sps:$4 sm:$0xff]   ;;  %v1383_v38 = vld [vmem:[%s1653_s21 + $0x98] ss:$12 sps:$4 sm:$0xff]   ;;  %v1371_v39 = vld [vmem:[%s1653_s21 + $0x48] ss:$12 sps:$4 sm:$0xff]  }
  0x55   : > { %1228 = vmatprep.subr.bf16.mxu1 %v1343_v12  ;;  %v1372_v40 = vld [vmem:[%s1653_s21 + $0x64] ss:$12 sps:$4 sm:$0xff]   ;;  %v1374_v42 = vld [vmem:[%s1653_s21 + $0x60] ss:$12 sps:$4 sm:$0xff]   ;;  %v1377_v43 = vld [vmem:[%s1653_s21 + $0x7c] ss:$12 sps:$4 sm:$0xff]  }
  0x56   : > { %1149 = vmatpush3.bf16.msra.mxu0 %v1342_v11  ;;  %v1384_v41 = vld [vmem:[%s1653_s21 + $0xb0] ss:$12 sps:$4 sm:$0xff]   ;;  %v1379_v44 = vld [vmem:[%s1653_s21 + $0x78] ss:$12 sps:$4 sm:$0xff]   ;;  %v1380_v45 = vld [vmem:[%s1653_s21 + $0x94] ss:$12 sps:$4 sm:$0xff]  }
  0x57   : > { %1150 = vmatprep.subr.bf16.mxu0 %v1344_v13  ;;  %v1382_v46 = vld [vmem:[%s1653_s21 + $0x90] ss:$12 sps:$4 sm:$0xff]   ;;  %v1385_v47 = vld [vmem:[%s1653_s21 + $0xac] ss:$12 sps:$4 sm:$0xff]   ;;  %v1387_v48 = vld [vmem:[%s1653_s21 + $0xa8] ss:$12 sps:$4 sm:$0xff]  }
  0x58   : > { %1229 = vmatpush3.bf16.msra.mxu1 %v1343_v12  ;;  %v290_v54 = vld [vmem:[#allocation2 + $0x30] sm:$0xff]  ;;  %v291_v62 = vld [vmem:[#allocation2] sm:$0xff]  ;;  %v292_v5 = vld [vmem:[#allocation2 + $0x58] sm:$0xff] }
  0x59   : > { %1230 = vmatprep.subr.bf16.mxu1 %v1346_v14  ;;  %v293_v12 = vld [vmem:[#allocation2 + $0x18] sm:$0xff] }
  0x5a   : > { %1151 = vmatpush3.bf16.msra.mxu0 %v1345_v15 }
  0x5b   : > { %1152 = vmatprep.subr.bf16.mxu0 %v1347_v16 }
  0x5c   : > { %1231 = vmatpush3.bf16.msra.mxu1 %v1346_v14 }
  0x5d   : > { %1232 = vmatprep.subr.bf16.mxu1 %v1349_v17 }
  0x5e   : > { %1153 = vmatpush3.bf16.msra.mxu0 %v1348_v18 }
  0x5f   : > { %1154 = vmatprep.subr.bf16.mxu0 %v1350_v19 }
  0x60   : > { %1233 = vmatpush3.bf16.msra.mxu1 %v1349_v17 }
  0x61   : > { %1234 = vmatprep.subr.bf16.mxu1 %v1352_v21 }
  0x62   : > { %1155 = vmatpush3.bf16.msra.mxu0 %v1351_v20  ;;  %v294_v20 = vld [vmem:[#allocation2 + $0x50] sm:$0xff] }
  0x63   : > { %1156 = vmatprep.subr.bf16.mxu0 %v1353_v22 }
  0x64   : > { %1235 = vmatpush3.bf16.msra.mxu1 %v1352_v21 }
  0x65   : > { %1236 = vmatprep.subr.bf16.mxu1 %v1355_v23 }
  0x66   : > { %1157 = vmatpush3.bf16.msra.mxu0 %v1354_v26 }
  0x68   : > { %1237 = vmatpush3.bf16.msra.mxu1 %v1355_v23 }
  0x69   : > { %691 = vmatmul.mubr.bf16.vlgmr.msra.gmra.mxu0 %v1356_v27  ;;  %v295_v27 = vld [vmem:[#allocation2 + $0x68] sm:$0xff] }
  0x6a   : > { %698 = vmatprep.mubr.bf16.mxu0 %v1361_v28 }
  0x6b   : > { %1239 = vmatmul.mubr.bf16.vlgmr.msra.gmra.mxu1 %v1360_v29 }
  0x6c   : > { %1242 = vmatprep.mubr.bf16.mxu1 %v1367_v30 }
  0x71   : > { %699 = vmatmul.mubr.bf16.gmra.mxu0 %v1363_v31 }
  0x72   : > { %706 = vmatprep.mubr.bf16.mxu0 %v1364_v32 }
  0x73   : > { %1243 = vmatmul.mubr.bf16.gmra.mxu1 %v1368_v33  ;;  %v296_v33 = vld [vmem:[#allocation2 + $0x8] sm:$0xff] }
  0x74   : > { %1246 = vmatprep.mubr.bf16.mxu1 %v1375_v34 }
  0x79   : > { %707 = vmatmul.mubr.bf16.gmra.mxu0 %v1366_v35 }
  0x7a   : > { %714 = vmatprep.mubr.bf16.mxu0 %v1369_v36 }
  0x7b   : > { %1247 = vmatmul.mubr.bf16.gmra.mxu1 %v1376_v37 }
  0x7c   : > { %1250 = vmatprep.mubr.bf16.mxu1 %v1383_v38 }
  0x81   : > { %715 = vmatmul.mubr.bf16.gmra.mxu0 %v1371_v39 }
  0x82   : > { %722 = vmatprep.mubr.bf16.mxu0 %v1372_v40  ;;  %v297_v40 = vld [vmem:[#allocation2 + $0x48] sm:$0xff] }
  0x83   : > { %1251 = vmatmul.mubr.bf16.gmra.mxu1 %v1384_v41 }
  0x89   : > { %723 = vmatmul.mubr.bf16.gmra.mxu0 %v1374_v42 }
  0x8a   : > { %730 = vmatprep.mubr.bf16.mxu0 %v1377_v43 }
  0x91   : > { %731 = vmatmul.mubr.bf16.gmra.mxu0 %v1379_v44 }
  0x92   : > { %738 = vmatprep.mubr.bf16.mxu0 %v1380_v45 }
  0x99   : > { %739 = vmatmul.mubr.bf16.gmra.mxu0 %v1382_v46 }
  0x9a   : > { %746 = vmatprep.mubr.bf16.mxu0 %v1385_v47 }
  0xa1   : > { %747 = vmatmul.mubr.bf16.gmra.mxu0 %v1387_v48  ;;  %v298_v48 = vld [vmem:[#allocation2 + $0x40] sm:$0xff] }
 0x129   : > { %v1158_v49 = vpop.f32.mrf.mxu0 }
 0x12b   : > { %v1159_v50 = vpop.f32.mrf.mxu0  ;;  %v1240_v51 = vpop.f32.mrf.mxu1 }
 0x12c   : > { %v1160_v52 = vadd.f32 %v1159_v50, %v1158_v49 }
 0x12d   : > { %v1161_v53 = vpop.f32.mrf.mxu0  ;;  %v789_v55 = vpop.f32.mrf.mxu1 }
 0x12e   : > { %v790_v56 = vadd.f32 %v1160_v52, %v789_v55  ;;  %v299_v55 = vld [vmem:[#allocation2 + $0x20] sm:$0xff] }
 0x12f   : > { %v1162_v57 = vpop.f32.mrf.mxu0  ;;  %v1241_v58 = vpop.f32.mrf.mxu1 }
 0x130   : > { %v852_v59 = vadd.f32 %v790_v56, %v290_v54  ;;  %v1163_v60 = vadd.f32 %v1162_v57, %v1161_v53 }
 0x131   : > { %v1164_v61 = vpop.f32.mrf.mxu0  ;;  %v792_v63 = vpop.f32.mrf.mxu1 }
 0x132   : > { %868 = vst [vmem:[#allocation2 + $0x30] sm:$0xff] %v852_v59  ;;  %v793_v0 = vadd.f32 %v1163_v60, %v792_v63 }
 0x133   : > { %v1165_v1 = vpop.f32.mrf.mxu0  ;;  %v1244_v2 = vpop.f32.mrf.mxu1 }
 0x134   : > { %v853_v3 = vadd.f32 %v793_v0, %v291_v62  ;;  %v1166_v4 = vadd.f32 %v1165_v1, %v1164_v61  ;;  %v300_v61 = vld [vmem:[#allocation2 + $0x10] sm:$0xff] }
 0x135   : > { %v1167_v6 = vpop.f32.mrf.mxu0  ;;  %v805_v9 = vpop.f32.mrf.mxu1 }
 0x136   : > { %869 = vst [vmem:[#allocation2] sm:$0xff] %v853_v3  ;;  %v798_v7 = vadd.f32 %v1240_v51, %v1166_v4  ;;  %v301_v4 = vld [vmem:[#allocation2 + $0x38] sm:$0xff] }
 0x137   : > { %v1168_v8 = vpop.f32.mrf.mxu0  ;;  %v1245_v16 = vpop.f32.mrf.mxu1 }
 0x138   : > { %v854_v10 = vadd.f32 %v798_v7, %v292_v5  ;;  %v1169_v11 = vadd.f32 %v1168_v8, %v1167_v6 }
 0x139   : > { %v1170_v13 = vpop.f32.mrf.mxu0  ;;  %v808_v23 = vpop.f32.mrf.mxu1 }
 0x13a   : > { %870 = vst [vmem:[#allocation2 + $0x58] sm:$0xff] %v854_v10  ;;  %v801_v14 = vadd.f32 %v1241_v58, %v1169_v11 }
 0x13b   : > { %v1171_v15 = vpop.f32.mrf.mxu0  ;;  %v1248_v30 = vpop.f32.mrf.mxu1 }
 0x13c   : > { %v855_v17 = vadd.f32 %v801_v14, %v293_v12  ;;  %v1172_v18 = vadd.f32 %v1171_v15, %v1170_v13  ;;  %v302_v12 = vld [vmem:[#allocation2 + $0x60] sm:$0xff] }
 0x13d   : > { %v1173_v19 = vpop.f32.mrf.mxu0  ;;  %v821_v37 = vpop.f32.mrf.mxu1 }
 0x13e   : > { %871 = vst [vmem:[#allocation2 + $0x18] sm:$0xff] %v855_v17  ;;  %v806_v21 = vadd.f32 %v1172_v18, %v805_v9 }
 0x13f   : > { %v1174_v22 = vpop.f32.mrf.mxu0  ;;  %v1249_v44 = vpop.f32.mrf.mxu1 }
 0x140   : > { %v856_v24 = vadd.f32 %v806_v21, %v294_v20  ;;  %v1175_v25 = vadd.f32 %v1174_v22, %v1173_v19  ;;  %v303_v19 = vld [vmem:[#allocation2 + $0x70] sm:$0xff] }
 0x141   : > { %v1176_v26 = vpop.f32.mrf.mxu0  ;;  %v824_v51 = vpop.f32.mrf.mxu1 }
 0x142   : > { %872 = vst [vmem:[#allocation2 + $0x50] sm:$0xff] %v856_v24  ;;  %v809_v28 = vadd.f32 %v1175_v25, %v808_v23  ;;  %v304_v24 = vld [vmem:[#allocation2 + $0x78] sm:$0xff] }
 0x143   : > { %v1177_v29 = vpop.f32.mrf.mxu0  ;;  %v1252_v58 = vpop.f32.mrf.mxu1 }
 0x144   : > { %v857_v31 = vadd.f32 %v809_v28, %v295_v27  ;;  %v1178_v32 = vadd.f32 %v1177_v29, %v1176_v26 }
 0x145   : > { %v1179_v34 = vpop.f32.mrf.mxu0  ;;  %v837_v1 = vpop.f32.mrf.mxu1 }
 0x146   : > { %873 = vst [vmem:[#allocation2 + $0x68] sm:$0xff] %v857_v31  ;;  %v814_v35 = vadd.f32 %v1244_v2, %v1178_v32 }
 0x147   : > { %v1180_v36 = vpop.f32.mrf.mxu0  ;;  %v1253_v8 = vpop.f32.mrf.mxu1 }
 0x148   : > { %v858_v38 = vadd.f32 %v814_v35, %v296_v33  ;;  %v1181_v39 = vadd.f32 %v1180_v36, %v1179_v34 }
 0x149   : > { %v1182_v41 = vpop.f32.mrf.mxu0  ;;  %v840_v15 = vpop.f32.mrf.mxu1 }
 0x14a   : > { %874 = vst [vmem:[#allocation2 + $0x8] sm:$0xff] %v858_v38  ;;  %v817_v42 = vadd.f32 %v1245_v16, %v1181_v39 }
 0x14b   : > { %v1183_v43 = vpop.f32.mrf.mxu0 }
 0x14c   : > { %v859_v45 = vadd.f32 %v817_v42, %v297_v40  ;;  %v1184_v46 = vadd.f32 %v1183_v43, %v1182_v41 }
 0x14d   : > { %v1185_v47 = vpop.f32.mrf.mxu0 }
 0x14e   : > { %875 = vst [vmem:[#allocation2 + $0x48] sm:$0xff] %v859_v45  ;;  %v822_v49 = vadd.f32 %v1184_v46, %v821_v37 }
 0x14f   : > { %v1186_v50 = vpop.f32.mrf.mxu0 }
 0x150   : > { %v860_v52 = vadd.f32 %v822_v49, %v298_v48  ;;  %v1187_v53 = vadd.f32 %v1186_v50, %v1185_v47 }
 0x151   : > { %v1188_v54 = vpop.f32.mrf.mxu0 }
 0x152   : > { %876 = vst [vmem:[#allocation2 + $0x40] sm:$0xff] %v860_v52  ;;  %v825_v56 = vadd.f32 %v1187_v53, %v824_v51 }
 0x153   : > { %v1189_v57 = vpop.f32.mrf.mxu0 }
 0x154   : > { %v861_v59 = vadd.f32 %v825_v56, %v299_v55  ;;  %v1190_v60 = vadd.f32 %v1189_v57, %v1188_v54 }
 0x155   : > { %v1191_v62 = vpop.f32.mrf.mxu0 }
 0x156   : > { %877 = vst [vmem:[#allocation2 + $0x20] sm:$0xff] %v861_v59  ;;  %v830_v63 = vadd.f32 %v1248_v30, %v1190_v60  ;;  %v305_v30 = vld [vmem:[#allocation2 + $0x28] sm:$0xff] }
 0x157   : > { %v1192_v0 = vpop.f32.mrf.mxu0 }
 0x158   : > { %v862_v2 = vadd.f32 %v830_v63, %v300_v61  ;;  %v1193_v3 = vadd.f32 %v1192_v0, %v1191_v62 }
 0x159   : > { %v1194_v5 = vpop.f32.mrf.mxu0 }
 0x15a   : > { %878 = vst [vmem:[#allocation2 + $0x10] sm:$0xff] %v862_v2  ;;  %v833_v6 = vadd.f32 %v1249_v44, %v1193_v3 }
 0x15b   : > { %v1195_v7 = vpop.f32.mrf.mxu0 }
 0x15c   : > { %v863_v9 = vadd.f32 %v833_v6, %v301_v4  ;;  %v1196_v10 = vadd.f32 %v1195_v7, %v1194_v5 }
 0x15d   : > { %v1197_v11 = vpop.f32.mrf.mxu0 }
 0x15e   : > { %879 = vst [vmem:[#allocation2 + $0x38] sm:$0xff] %v863_v9  ;;  %v838_v13 = vadd.f32 %v1196_v10, %v837_v1 }
 0x15f   : > { %v1198_v14 = vpop.f32.mrf.mxu0 }
 0x160   : > { %v864_v16 = vadd.f32 %v838_v13, %v302_v12  ;;  %v1199_v17 = vadd.f32 %v1198_v14, %v1197_v11 }
 0x161   : > { %v1200_v18 = vpop.f32.mrf.mxu0 }
 0x162   : > { %880 = vst [vmem:[#allocation2 + $0x60] sm:$0xff] %v864_v16  ;;  %v841_v20 = vadd.f32 %v1199_v17, %v840_v15 }
 0x163   : > { %v1201_v21 = vpop.f32.mrf.mxu0 }
 0x164   : > { %v865_v22 = vadd.f32 %v841_v20, %v303_v19  ;;  %v1202_v23 = vadd.f32 %v1201_v21, %v1200_v18 }
 0x165   : > { %v1203_v25 = vpop.f32.mrf.mxu0 }
 0x166   : > { %881 = vst [vmem:[#allocation2 + $0x70] sm:$0xff] %v865_v22  ;;  %v846_v26 = vadd.f32 %v1252_v58, %v1202_v23 }
 0x167   : > { %v1204_v27 = vpop.f32.mrf.mxu0 }
 0x168   : > { %v866_v28 = vadd.f32 %v846_v26, %v304_v24  ;;  %v1205_v29 = vadd.f32 %v1204_v27, %v1203_v25 }
 0x16a   : > { %882 = vst [vmem:[#allocation2 + $0x78] sm:$0xff] %v866_v28  ;;  %v849_v31 = vadd.f32 %v1253_v8, %v1205_v29  ;;  %887 = sbr.rel (%p1134_p7) target bundleno = 380 (0x17c), region = 48 }
 0x16c   : > { %v867_v32 = vadd.f32 %v849_v31, %v305_v30 }
 0x16e   : > { %883 = vst [vmem:[#allocation2 + $0x28] sm:$0xff] %v867_v32 }
 0x16f   : > { %v888_v33 = vld [vmem:[#allocation2 + $0x30] sm:$0xff]  ;;  %v1135_v34 = vld [vmem:[%s1755_s2] ss:$0 sm:$0xff]  ;;  %v890_v38 = vld [vmem:[#allocation2 + $0x58] sm:$0xff] }
 0x170   : > { %v889_v35 = vld [vmem:[#allocation2] sm:$0xff]  ;;  %v911_v36 = vadd.f32 %v1135_v34, %v888_v33  ;;  %v891_v39 = vld [vmem:[#allocation2 + $0x18] sm:$0xff]  ;;  %v892_v40 = vld [vmem:[#allocation2 + $0x50] sm:$0xff]  ;;  %v913_v41 = vadd.f32 %v1135_v34, %v890_v38 }
 0x171   : > { %v912_v37 = vadd.f32 %v1135_v34, %v889_v35  ;;  %v914_v42 = vadd.f32 %v1135_v34, %v891_v39  ;;  %v915_v43 = vadd.f32 %v1135_v34, %v892_v40  ;;  %v893_v44 = vld [vmem:[#allocation2 + $0x68] sm:$0xff]  ;;  %v896_v51 = vld [vmem:[#allocation2 + $0x40] sm:$0xff]  ;;  %v898_v53 = vld [vmem:[#allocation2 + $0x10] sm:$0xff] }
 0x172   : > { %v894_v45 = vld [vmem:[#allocation2 + $0x8] sm:$0xff]  ;;  %v927_v47 = vmax.f32 %v911_v36, 0.0  ;;  %v916_v49 = vadd.f32 %v1135_v34, %v893_v44  ;;  %v897_v52 = vld [vmem:[#allocation2 + $0x20] sm:$0xff]  ;;  %v929_v54 = vmax.f32 %v913_v41, 0.0  ;;  %v899_v58 = vld [vmem:[#allocation2 + $0x38] sm:$0xff]  ;;  %v919_v63 = vadd.f32 %v1135_v34, %v896_v51 }
 0x173   : > { %v895_v46 = vld [vmem:[#allocation2 + $0x48] sm:$0xff]  ;;  %v928_v48 = vmax.f32 %v912_v37, 0.0  ;;  %v917_v50 = vadd.f32 %v1135_v34, %v894_v45  ;;  %v930_v55 = vmax.f32 %v914_v42, 0.0  ;;  %v931_v56 = vmax.f32 %v915_v43, 0.0  ;;  %v900_v59 = vld [vmem:[#allocation2 + $0x60] sm:$0xff]  ;;  %v901_v60 = vld [vmem:[#allocation2 + $0x70] sm:$0xff] }
 0x174   : > { %v918_v57 = vadd.f32 %v1135_v34, %v895_v46  ;;  %943 = vst [vmem:[#allocation8] sm:$0xff] %v927_v47  ;;  %v932_v61 = vmax.f32 %v916_v49, 0.0  ;;  %v920_v0 = vadd.f32 %v1135_v34, %v897_v52  ;;  %v902_v1 = vld [vmem:[#allocation2 + $0x78] sm:$0xff]  ;;  %945 = vst [vmem:[#allocation8 + $0x10] sm:$0xff] %v929_v54  ;;  %v921_v4 = vadd.f32 %v1135_v34, %v898_v53 }
 0x175   : > { %944 = vst [vmem:[#allocation8 + $0x8] sm:$0xff] %v928_v48  ;;  %v933_v62 = vmax.f32 %v917_v50, 0.0  ;;  %v903_v2 = vld [vmem:[#allocation2 + $0x28] sm:$0xff]  ;;  %946 = vst [vmem:[#allocation8 + $0x18] sm:$0xff] %v930_v55  ;;  %v922_v5 = vadd.f32 %v1135_v34, %v899_v58  ;;  %v923_v6 = vadd.f32 %v1135_v34, %v900_v59  ;;  %v935_v7 = vmax.f32 %v919_v63, 0.0 }
 0x176   : > { %947 = vst [vmem:[#allocation8 + $0x20] sm:$0xff] %v931_v56  ;;  %v934_v3 = vmax.f32 %v918_v57, 0.0  ;;  %948 = vst [vmem:[#allocation8 + $0x28] sm:$0xff] %v932_v61  ;;  %v936_v8 = vmax.f32 %v920_v0, 0.0  ;;  %v924_v9 = vadd.f32 %v1135_v34, %v901_v60  ;;  %v925_v10 = vadd.f32 %v1135_v34, %v902_v1 }
 0x177   : > { %949 = vst [vmem:[#allocation8 + $0x30] sm:$0xff] %v933_v62  ;;  %v937_v11 = vmax.f32 %v921_v4, 0.0  ;;  %v938_v12 = vmax.f32 %v922_v5, 0.0  ;;  %v939_v13 = vmax.f32 %v923_v6, 0.0  ;;  %v926_v14 = vadd.f32 %v1135_v34, %v903_v2  ;;  %951 = vst [vmem:[#allocation8 + $0x40] sm:$0xff] %v935_v7 }
 0x178   : > { %950 = vst [vmem:[#allocation8 + $0x38] sm:$0xff] %v934_v3  ;;  %952 = vst [vmem:[#allocation8 + $0x48] sm:$0xff] %v936_v8  ;;  %v940_v15 = vmax.f32 %v924_v9, 0.0  ;;  %v941_v16 = vmax.f32 %v925_v10, 0.0 }
 0x179   : > { %953 = vst [vmem:[#allocation8 + $0x50] sm:$0xff] %v937_v11  ;;  %954 = vst [vmem:[#allocation8 + $0x58] sm:$0xff] %v938_v12  ;;  %v942_v17 = vmax.f32 %v926_v14, 0.0 }
 0x17a   : > { %955 = vst [vmem:[#allocation8 + $0x60] sm:$0xff] %v939_v13  ;;  %956 = vst [vmem:[#allocation8 + $0x68] sm:$0xff] %v940_v15 }
 0x17b   : > { %957 = vst [vmem:[#allocation8 + $0x70] sm:$0xff] %v941_v16  ;;  %958 = vst [vmem:[#allocation8 + $0x78] sm:$0xff] %v942_v17 }
 0x17c PF: > { %p1720_p11 = scmp.eq.s32.totalorder %s1078_s18, 2  ;;  %s1536_s25 = smov [#allocation8]  }
 0x17d   : > { %s969_s28 = sshll.u32 %s1536_s25, 4  ;;  %s970_s28 = int_to_ptr.vmem [resolvable:$true] %s969_s28 }
 0x17e   : > { %s1444_s7 = scalar_lea.vmem %s970_s28, 2048  ;;  %p1451_p6 = scmp.lt.s32.totalorder %s970_s28, %s970_s28 }
 0x17f   : > { %p1445_p3 = scmp.ne.s32.totalorder %s970_s28, %s1444_s7  ;;  %p1452_p8 = scmp.lt.s32.totalorder %s1444_s7, %s1444_s7 }
 0x181   : > { %p1446_p4 = pnand %p1445_p3, %p1720_p11  ;;  %p1453_p12 = por %p1452_p8, %p1451_p6 }
 0x183   : > { %p1447_p5 = pneg %p1446_p4 }
 0x185   : > { %p1454_p13 = pnand %p1453_p12, %p1447_p5 }
 0x187   : > { %1457 = shalt.err (!%p1454_p13)
}
 0x188   : > { %s1537_s8 = smov 128   ;;  %s1538_s18 = smov 8  }
 0x189   : > { %1262 = dma.vmem_to_hbm [thread:$0]  (%p1720_p11), %s970_s28, 2048, %s1756_s3, [#allocation5], %s1537_s8, %s1537_s8, %s1538_s18  }
 0x18a   : > { %1501 = dma.done.wait (%p1720_p11), [#allocation5], 2048  }
 0x18b   : > { %1503 = vsyncadd (%p1720_p11), [#allocation5], 4294965248 }
 0x18c PF: > { %s20_s17 = sadd.s32 1, %s1526_s17   ;;  %s1761_s12 = smov %s1510_s13 }
 0x18d   : > { %p17_p10 = scmp.ge.s32.totalorder %s20_s17, 5   ;;  %s1762_s13 = smov %s1514_s14 }
 0x18e   : > { %s1763_s14 = smov %s1606_s23  ;;  %s1764_s15 = smov %s1522_s16 }
 0x18f   : > { %s1765_s16 = smov %s1767_s19  ;;  %19 = sbr.rel (!%p17_p10) target bundleno = 7 (0x7), region = 94 }
 0x194   :  { %985 = vsyncpa [#allocation4], 1 }
 0x195   :  { %987 = vsyncpa [#allocation4 + $0x1], 1 }
 0x196   :  { %988 = vsyncpa [#allocation7], 1 }
 0x197   :  { %990 = vsyncpa [#allocation7 + $0x1], 1 }
 0x198   :  { %991 = vsyncpa [#allocation5], 1 }
 0x199   :  { %993 = vsyncpa [#allocation5 + $0x1], 1 }

</bundles_post_ra>
